<compile_context>
chip_gen: v7x
topology: tpu7x:2x2x1
jax: 0.10.0
libtpu: 0.0.40
codegen_flags: <defaults>
</compile_context>

<pallas_src>
import math
import numpy as np
import jax
import jax.numpy as jnp
from jax.experimental import pallas as pl
from jax.experimental.pallas import tpu as pltpu


# ----------------------------- Pallas kernel ------------------------------ #
def qconv_kernel(x_ref, w_ref, z_ref, o_ref):
    # x_ref : (D, TP)        one patch per lane-column, zero-padded to D rows
    # w_ref : (2*F*D, D)     stacked [Re(U_0); Im(U_0); Re(U_1); Im(U_1); ...]
    # z_ref : (F*nq, 2*F*D)  block-diagonal PauliZ sign table (Re & Im blocks)
    # o_ref : (F*nq, TP)     expectation values, lane-dense
    x = x_ref[...]                                             # f32 (D, TP)
    # AmplitudeEmbedding: L2-normalize each (zero-padded) patch column.
    sq = jnp.sum(x * x, axis=0, keepdims=True)                 # (1, TP)
    inv = jnp.where(sq > 0.0, jax.lax.rsqrt(jnp.maximum(sq, 1e-30)), 0.0)
    xn = x * inv                                               # (D, TP)
    # psi (Re/Im of all filters stacked) = W @ v  -- single MXU matmul, N=TP
    psi = jnp.dot(w_ref[...], xn, preferred_element_type=jnp.float32)
    prob = psi * psi                                           # |Re|^2, |Im|^2
    # <Z_q> per filter: block-diag sign contraction, again N=TP on the lanes
    o_ref[...] = jnp.dot(z_ref[...], prob, preferred_element_type=jnp.float32)


def qconv_expvals(xT, Wmat, Zbig, tile_p=512):
    """xT:(D, P) patches-as-columns -> (F*nq, P) expectation values."""
    D, P = xT.shape
    nrows = Zbig.shape[0]
    p128 = -(-P // 128) * 128
    tile_p = min(tile_p, p128)                 # don't over-pad tiny problems
    if p128 // tile_p < 2 and p128 >= 256:     # keep >=2 steps for v7x 2-TC
        tile_p = max(128, (p128 // 256) * 128)
    P_pad = -(-P // tile_p) * tile_p
    if P_pad != P:
        xT = jnp.pad(xT, ((0, 0), (0, P_pad - P)))

    out = pl.pallas_call(
        qconv_kernel,
        out_shape=jax.ShapeDtypeStruct((nrows, P_pad), jnp.float32),
        grid_spec=pltpu.PrefetchScalarGridSpec(
            num_scalar_prefetch=0,
            grid=(P_pad // tile_p,),
            in_specs=[
                pl.BlockSpec((D, tile_p), lambda i: (0, i)),
                pl.BlockSpec(Wmat.shape, lambda i: (0, 0)),   # constant block
                pl.BlockSpec(Zbig.shape, lambda i: (0, 0)),   # constant block
            ],
            out_specs=pl.BlockSpec((nrows, tile_p), lambda i: (0, i)),
        ),
        compiler_params=pltpu.CompilerParams(
            dimension_semantics=("parallel",)),
    )(xT, Wmat, Zbig)
    return out[:, :P]


# ----------------- circuit unitary (parameter-only, host glue) ------------ #
def _gate_on_wire(g2, wire, n):
    U = np.eye(1, dtype=np.complex128)
    for w in range(n):
        U = np.kron(U, g2 if w == wire else np.eye(2, dtype=np.complex128))
    return U


def _cnot(control, target, n):
    dim = 2 ** n
    U = np.zeros((dim, dim), dtype=np.complex128)
    for s in range(dim):
        t = s ^ (1 << (n - 1 - target)) if (s >> (n - 1 - control)) & 1 else s
        U[t, s] = 1.0
    return U


def _rot(phi, theta, omega):
    # PennyLane Rot(phi, theta, omega) = RZ(omega) RY(theta) RZ(phi)
    c, s = np.cos(theta / 2.0), np.sin(theta / 2.0)
    return np.array(
        [[np.exp(-1j * (phi + omega) / 2) * c, -np.exp(1j * (phi - omega) / 2) * s],
         [np.exp(-1j * (phi - omega) / 2) * s,  np.exp(1j * (phi + omega) / 2) * c]],
        dtype=np.complex128)


def strongly_entangling_unitary(weights, n_qubits, n_repeats):
    """Unitary of StronglyEntanglingLayers(weights) applied n_repeats times."""
    n_layers = weights.shape[0]
    dim = 2 ** n_qubits
    U = np.eye(dim, dtype=np.complex128)
    ranges = ([(l % (n_qubits - 1)) + 1 for l in range(n_layers)]
              if n_qubits > 1 else [0] * n_layers)
    for _ in range(n_repeats):
        for l in range(n_layers):
            for w in range(n_qubits):
                g = _rot(weights[l, w, 0], weights[l, w, 1], weights[l, w, 2])
                U = _gate_on_wire(g, w, n_qubits) @ U
            if n_qubits > 1:
                for w in range(n_qubits):
                    U = _cnot(w, (w + ranges[l]) % n_qubits, n_qubits) @ U
    return U


def build_filter_constants(weights_list, n_qubits, n_layers):
    """Stacked Re/Im unitaries and block-diagonal PauliZ sign table."""
    F = len(weights_list)
    D = 2 ** n_qubits
    Wmat = np.zeros((2 * F * D, D), dtype=np.float32)
    Zbig = np.zeros((F * n_qubits, 2 * F * D), dtype=np.float32)
    idx = np.arange(D)
    for f, w in enumerate(weights_list):
        U = strongly_entangling_unitary(np.asarray(w, dtype=np.float64),
                                        n_qubits, n_layers)
        Wmat[f * 2 * D: f * 2 * D + D] = np.real(U).astype(np.float32)
        Wmat[f * 2 * D + D: f * 2 * D + 2 * D] = np.imag(U).astype(np.float32)
        for q in range(n_qubits):
            # PennyLane convention: wire 0 is the most-significant basis bit.
            z = (1.0 - 2.0 * ((idx >> (n_qubits - 1 - q)) & 1)).astype(np.float32)
            Zbig[f * n_qubits + q, f * 2 * D: f * 2 * D + D] = z          # |Re|^2
            Zbig[f * n_qubits + q, f * 2 * D + D: f * 2 * D + 2 * D] = z  # |Im|^2
    return Wmat, Zbig


# ------------------------------ forward pass ------------------------------ #
def qconv2d_mf_forward(x, weights_list, kernel_size, n_layers, stride):
    """Forward of QConv2D_MF: x (B,C,H,W) -> (B, filters*n_qubits, out, out)."""
    B, C, H, W = x.shape
    assert H == W and stride > 0
    k = kernel_size
    n_qubits = int(math.ceil(math.log(C * k * k, 2)))
    D = 2 ** n_qubits
    out_hw = (H - k) // stride + 1
    F = len(weights_list)

    Wmat, Zbig = build_filter_constants(weights_list, n_qubits, n_layers)

    # Fused sliding-window extraction in torch.flatten (C, kh, kw) order;
    # channels of the result are channel-major, filter-spatial-minor.
    patches = jax.lax.conv_general_dilated_patches(
        x, (k, k), (stride, stride), padding='VALID',
        dimension_numbers=('NCHW', 'OIHW', 'NCHW'),
        precision=jax.lax.Precision.HIGHEST)          # (B, C*k*k, oh, ow)
    D0 = C * k * k
    xT = jnp.transpose(patches, (1, 0, 2, 3)).reshape(D0, B * out_hw * out_hw)
    if D0 < D:                                         # AmplitudeEmbedding pad 0
        xT = jnp.pad(xT, ((0, D - D0), (0, 0)))

    ev = qconv_expvals(xT.astype(jnp.float32),
                       jnp.asarray(Wmat), jnp.asarray(Zbig))   # (F*nq, P)
    out = ev.reshape(F * n_qubits, B, out_hw, out_hw).transpose(1, 0, 2, 3)
    return out                                          # (B, F*nq, out, out)


if __name__ == "__main__":
    key = jax.random.PRNGKey(0)
    kx, kw = jax.random.split(key)

    B, C, H = 2, 4, 16
    kernel_size, n_layers, stride, filters = 2, 2, 2, 2
    n_qubits = int(math.ceil(math.log(C * kernel_size ** 2, 2)))   # = 4

    x = jax.random.normal(kx, (B, C, H, H), dtype=jnp.float32)
    # deterministic per-filter weights, uniform [0, 2*pi) like TorchLayer init
    wkeys = jax.random.split(kw, filters)
    weights_list = [np.asarray(jax.random.uniform(
        k_, (n_layers, n_qubits, 3), minval=0.0, maxval=2.0 * math.pi,
        dtype=jnp.float32)) for k_ in wkeys]

    out = qconv2d_mf_forward(x, weights_list, kernel_size, n_layers, stride)
    out = jax.block_until_ready(out)

    out_hw = (H - kernel_size) // stride + 1
    assert out.shape == (B, filters * n_qubits, out_hw, out_hw), out.shape
    assert bool(jnp.all(jnp.isfinite(out)))
    assert bool(jnp.all(jnp.abs(out) <= 1.0 + 1e-4))   # expvals of PauliZ
    print("KERNEL_OK")
</pallas_src>

<mosaic_0001>
module attributes {stable_mosaic.version = 11 : i64} {
  func.func @qconv_kernel(%arg0: i32, %arg1: memref<16x128xf32, #tpu.memory_space<vmem>>, %arg2: memref<64x16xf32, #tpu.memory_space<vmem>>, %arg3: memref<8x64xf32, #tpu.memory_space<vmem>>, %arg4: memref<8x128xf32, #tpu.memory_space<vmem>>) attributes {dimension_semantics = [#tpu.dimension_semantics<parallel>], iteration_bounds = array<i64: 1>, scalar_prefetch = 0 : i64, scratch_operands = 0 : i64, tpu.core_type = #tpu.core_type<tc>, window_params = [{transform_indices = @transform_0, window_bounds = array<i64: 16, 128>}, {pipeline_mode = #tpu.pipeline_mode<synchronous>, transform_indices = @transform_1, window_bounds = array<i64: 64, 16>}, {pipeline_mode = #tpu.pipeline_mode<synchronous>, transform_indices = @transform_2, window_bounds = array<i64: 8, 64>}, {transform_indices = @transform_3, window_bounds = array<i64: 8, 128>}]} {
    %c0 = arith.constant 0 : index
    %c0_0 = arith.constant 0 : index
    %0 = vector.load %arg1[%c0, %c0_0] : memref<16x128xf32, #tpu.memory_space<vmem>>, vector<16x128xf32>
    %1 = arith.mulf %0, %0 : vector<16x128xf32>
    %cst = arith.constant dense<0.000000e+00> : vector<128xf32>
    %2 = vector.multi_reduction <add>, %1, %cst [0] : vector<16x128xf32> to vector<128xf32>
    %3 = vector.shape_cast %2 : vector<128xf32> to vector<1x128xf32>
    %cst_1 = arith.constant 0.000000e+00 : f32
    %4 = vector.broadcast %cst_1 : f32 to vector<1x128xf32>
    %5 = arith.cmpf ogt, %3, %4 : vector<1x128xf32>
    %cst_2 = arith.constant 1.000000e-30 : f32
    %6 = vector.broadcast %cst_2 : f32 to vector<1x128xf32>
    %7 = arith.maximumf %3, %6 : vector<1x128xf32>
    %8 = math.rsqrt %7 : vector<1x128xf32>
    %cst_3 = arith.constant 0.000000e+00 : f32
    %9 = vector.broadcast %cst_3 : f32 to vector<1x128xf32>
    %10 = arith.select %5, %8, %9 : vector<1x128xi1>, vector<1x128xf32>
    %11 = vector.broadcast %10 : vector<1x128xf32> to vector<16x128xf32>
    %12 = arith.mulf %0, %11 : vector<16x128xf32>
    %c0_4 = arith.constant 0 : index
    %c0_5 = arith.constant 0 : index
    %13 = vector.load %arg2[%c0_4, %c0_5] : memref<64x16xf32, #tpu.memory_space<vmem>>, vector<64x16xf32>
    %cst_6 = arith.constant dense<0.000000e+00> : vector<64x128xf32>
    %14 = tpu.matmul %13, %12, %cst_6 {dimension_numbers = #tpu.dot_dimension_numbers<[1], [0], [0], [1], [0, 0, 1, 1], [], []>} : vector<64x16xf32>, vector<16x128xf32>, vector<64x128xf32> -> vector<64x128xf32>
    %15 = arith.mulf %14, %14 : vector<64x128xf32>
    %c0_7 = arith.constant 0 : index
    %c0_8 = arith.constant 0 : index
    %16 = vector.load %arg3[%c0_7, %c0_8] : memref<8x64xf32, #tpu.memory_space<vmem>>, vector<8x64xf32>
    %cst_9 = arith.constant dense<0.000000e+00> : vector<8x128xf32>
    %17 = tpu.matmul %16, %15, %cst_9 {dimension_numbers = #tpu.dot_dimension_numbers<[1], [0], [0], [1], [0, 0, 1, 1], [], []>} : vector<8x64xf32>, vector<64x128xf32>, vector<8x128xf32> -> vector<8x128xf32>
    %c0_10 = arith.constant 0 : index
    %c0_11 = arith.constant 0 : index
    %18 = vector.load %arg4[%c0_10, %c0_11] : memref<8x128xf32, #tpu.memory_space<vmem>>, vector<8x128xf32>
    tpu.vector_store %arg4[%c0_10, %c0_11], %17 {strides = array<i32>} : memref<8x128xf32, #tpu.memory_space<vmem>>, vector<8x128xf32>,
    return
  }
  func.func @transform_0(%arg0: i32) -> (i32, i32) {
    %c0_i32 = arith.constant 0 : i32
    %c0_i32_0 = arith.constant 0 : i32
    return %c0_i32, %arg0 : i32, i32
  }
  func.func @transform_1(%arg0: i32) -> (i32, i32) {
    %c0_i32 = arith.constant 0 : i32
    %c0_i32_0 = arith.constant 0 : i32
    %c0_i32_1 = arith.constant 0 : i32
    return %c0_i32, %c0_i32_0 : i32, i32
  }
  func.func @transform_2(%arg0: i32) -> (i32, i32) {
    %c0_i32 = arith.constant 0 : i32
    %c0_i32_0 = arith.constant 0 : i32
    %c0_i32_1 = arith.constant 0 : i32
    return %c0_i32, %c0_i32_0 : i32, i32
  }
  func.func @transform_3(%arg0: i32) -> (i32, i32) {
    %c0_i32 = arith.constant 0 : i32
    %c0_i32_0 = arith.constant 0 : i32
    return %c0_i32, %arg0 : i32, i32
  }
}

</mosaic_0001>

<bundles_post_ra>
// kernel: tpu_custom_call.1
= control target key start
LH: loop header
LB: loop body
LE: loop exit
PB: predicated region body
PF: predicated region fallthrough
CT: control target
= control target key end

     0   :  { %vm40_vm0 = vcmask 130048   ;;  %s454_s0 = inlined_call_operand.vmem [shape: f32[16,128], index: 0, kind: input, shape index: {}]   ;;  %s455_s1 = inlined_call_operand.vmem [shape: f32[64,16], index: 1, kind: input, shape index: {}]   ;;  %s456_s2 = inlined_call_operand.vmem [shape: f32[8,64], index: 2, kind: input, shape index: {}]   ;;  %s457_s3 = inlined_call_operand.hbm [shape: f32[8,128], index: 3, kind: output, shape index: {}]  }
   0x1   :  { %v15_v0 = vld [vmem:[%s454_s0] sm:$0xff]  ;;  %v16_v1 = vld [vmem:[%s454_s0 + $0x8] sm:$0xff] }
   0x2   :  { %v32_v2 = vld [vmem:[%s455_s1] sm:$0xff]  ;;  %v17_v3 = vmul.f32 %v15_v0, %v15_v0  ;;  %v18_v4 = vmul.f32 %v16_v1, %v16_v1 }
   0x3   :  { %300 = vmatprep.mubr.msk.f32.mxu0 %vm40_vm0, %v32_v2 }
   0x4   :  { %v19_v5 = vadd.f32 %v18_v4, %v17_v3 }
   0x5   :  { %8 = vsyncpa [#allocation3], 0  ;;  %v33_v18 = vld [vmem:[%s455_s1 + $0x8] sm:$0xff]  ;;  %v34_v19 = vld [vmem:[%s455_s1 + $0x10] sm:$0xff]  ;;  %v377_v25 = vmov 0.0|0.0   ;;  %vm378_vm2 = vmmov 0  }
   0x6   :  { %v20_v6 = vrot.slane %v19_v5, 4  ;;  %v35_v20 = vld [vmem:[%s455_s1 + $0x18] sm:$0xff]  ;;  %v36_v21 = vld [vmem:[%s455_s1 + $0x20] sm:$0xff]  ;;  %v37_v22 = vld [vmem:[%s455_s1 + $0x28] sm:$0xff]  ;;  %335 = vmatprep.subr.bf16.mxu1 %v377_v25  ;;  %v379_v26 = vmov 0.0   ;;  %vm179_vm3 = vcmask 523264  }
   0x7   :  { %v38_v23 = vld [vmem:[%s455_s1 + $0x30] sm:$0xff]  ;;  %v39_v24 = vld [vmem:[%s455_s1 + $0x38] sm:$0xff]  ;;  %328 = vmatprep.mubr.msk.f32.mxu1 %vm378_vm2, %v379_v26  ;;  %v178_v47 = vld [vmem:[%s456_s2] sm:$0xff]  ;;  %s380_s5 = smov [#allocation2]  }
   0x8   :  { %v21_v7 = vadd.f32 %v20_v6, %v19_v5  ;;  %s260_s6 = sshll.u32 %s380_s5, 4  ;;  %s261_s6 = int_to_ptr.vmem [resolvable:$true] %s260_s6 }
   0x9   :  { %s353_s7 = scalar_lea.vmem %s261_s6, 128  ;;  %p358_p1 = scmp.lt.s32.totalorder %s261_s6, %s261_s6 }
   0xa   :  { %v22_v8 = vrot.slane %v21_v7, 2  ;;  %p354_p0 = scmp.ne.s32.totalorder %s261_s6, %s353_s7  ;;  %p359_p2 = scmp.lt.s32.totalorder %s353_s7, %s353_s7 }
   0xc   :  { %v23_v9 = vadd.f32 %v22_v8, %v21_v7  ;;  %p360_p3 = por %p359_p2, %p358_p1 }
   0xe   :  { %v24_v10 = vrot.slane %v23_v9, 1  ;;  %p361_p4 = pnand %p360_p3, %p354_p0 }
  0x10   :  { %v25_v11 = vadd.f32 %v24_v10, %v23_v9 }
  0x12   :  { %v27_v12 = vmax.f32 %v25_v11, 1e-30  ;;  %vm26_vm1 = vcmp.gt.f32.partialorder %v25_v11, 0.0 }
  0x14   :  { %351 = vrsqrt.f32 %v27_v12 }
  0x1e   :  { %v352_v13 = vpop.eup %351 }
  0x1f   :  { %v29_v14 = vsel %vm26_vm1, %v352_v13, 0.0 }
  0x20   :  { %v30_v15 = vmul.f32 %v29_v14, %v15_v0  ;;  %v31_v16 = vmul.f32 %v29_v14, %v16_v1 }
  0x22   :  { %v331_v17 = vpack.c.bf16 %v31_v16, %v30_v15 }
  0x24   :  { %332 = vmatprep.subr.bf16.mxu0 %v331_v17 }
  0x25   :  { %334 = vmatpush3.bf16.msra.mxu0 %v331_v17 }
  0x28   :  { %301 = vmatmul.mubr.msk.f32.vlgmr.msra.gmra.mrb[0].mxu0 %vm40_vm0, %v33_v18 }
  0x29   :  { %303 = vmatprep.mubr.msk.f32.mxu0 %vm40_vm0, %v34_v19 }
  0x2c   :  { %304 = vmatmul.mubr.msk.f32.gmra.mrb[2].mxu0 %vm40_vm0, %v35_v20 }
  0x2d   :  { %306 = vmatprep.mubr.msk.f32.mxu0 %vm40_vm0, %v36_v21 }
  0x30   :  { %307 = vmatmul.mubr.msk.f32.gmra.mrb[4].mxu0 %vm40_vm0, %v37_v22 }
  0x31   :  { %309 = vmatprep.mubr.msk.f32.mxu0 %vm40_vm0, %v38_v23 }
  0x34   :  { %310 = vmatmul.mubr.msk.f32.gmra.mrb[6].mxu0 %vm40_vm0, %v39_v24 }
  0xfb   :  { %v302_v27 = vpop.f32.mrb[0].mxu0 }
  0xfc   :  { %v171_v28 = vmul.f32 %v302_v27, %v302_v27  ;;  %v131_v29 = vpop.f32.mrb[1].mxu0 }
  0xfd   :  { %v170_v30 = vmul.f32 %v131_v29, %v131_v29 }
  0xff   :  { %v305_v31 = vpop.f32.mrb[2].mxu0  ;;  %v336_v32 = vpack.c.bf16 %v171_v28, %v170_v30 }
 0x100   :  { %v173_v33 = vmul.f32 %v305_v31, %v305_v31  ;;  %v141_v34 = vpop.f32.mrb[3].mxu0 }
 0x101   :  { %v172_v35 = vmul.f32 %v141_v34, %v141_v34  ;;  %337 = vmatpush3.bf16.msra.mxu1 %v336_v32 }
 0x102   :  { %338 = vmatprep.subr.bf16.mxu1 %v377_v25 }
 0x103   :  { %v339_v36 = vpack.c.bf16 %v173_v33, %v172_v35  ;;  %v308_v37 = vpop.f32.mrb[4].mxu0 }
 0x104   :  { %v175_v38 = vmul.f32 %v308_v37, %v308_v37  ;;  %v151_v39 = vpop.f32.mrb[5].mxu0 }
 0x105   :  { %v174_v40 = vmul.f32 %v151_v39, %v151_v39  ;;  %340 = vmatpush3.bf16.msra.mxu1 %v339_v36 }
 0x106   :  { %341 = vmatprep.subr.bf16.mxu1 %v377_v25 }
 0x107   :  { %v342_v41 = vpack.c.bf16 %v175_v38, %v174_v40  ;;  %v311_v42 = vpop.f32.mrb[6].mxu0 }
 0x108   :  { %v177_v43 = vmul.f32 %v311_v42, %v311_v42  ;;  %v161_v44 = vpop.f32.mrb[7].mxu0 }
 0x109   :  { %v176_v45 = vmul.f32 %v161_v44, %v161_v44  ;;  %343 = vmatpush3.bf16.msra.mxu1 %v342_v41 }
 0x10a   :  { %344 = vmatprep.subr.bf16.mxu1 %v377_v25 }
 0x10b   :  { %v345_v46 = vpack.c.bf16 %v177_v43, %v176_v45 }
 0x10d   :  { %346 = vmatpush3.bf16.msra.mxu1 %v345_v46 }
 0x110   :  { %329 = vmatmul.mubr.msk.f32.vlgmr.msra.gmra.mrb[0].mxu1 %vm179_vm3, %v178_v47 }
 0x1e3   :  { %v249_v48 = vpop.f32.mrb[0].mxu1 }
 0x1e4   :  { %253 = vst [vmem:[#allocation2] sm:$0xff] %v249_v48  ;;  %v330_v49 = vpop.f32.mrb[1].mxu1 }
 0x1e5   :  { %364 = shalt.err (!%p361_p4)
}
 0x1e6   :  { %s365_s10 = scalar_lea.hbm %s457_s3, 128 }
 0x1e7   :  { %p366_p5 = scmp.ne.s32.totalorder %s457_s3, %s365_s10  ;;  %p369_p6 = scmp.lt.u32.totalorder %s365_s10, %s457_s3 }
 0x1e9   :  { %p371_p7 = pnand %p369_p6, %p366_p5 }
 0x1eb   :  { %374 = shalt.err (!%p371_p7)
}
 0x1ec   :  { %263 = dma.vmem_to_hbm [thread:$0]  %s261_s6, 128, %s457_s3, [#allocation3]  }
 0x1ed   :  { %375 = dma.done.wait [#allocation3], 128  }
 0x1ee   :  { %376 = vsyncadd [#allocation3], 4294967168 }
 0x1ef   :  { %267 = vsyncpa [#allocation3], 1 }

</bundles_post_ra>
